<compile_context>
chip_gen: v5e
topology: v5e:2x2
jax: 0.10.0
libtpu: 0.0.40
codegen_flags: <defaults>
</compile_context>

<pallas_src>
import functools

import jax
import jax.numpy as jnp
from jax.experimental import pallas as pl
from jax.experimental.pallas import tpu as pltpu


def _resblock_kernel(x_ref, w1_ref, b1_ref, w2_ref, b2_ref, mask_ref,
                     o_ref, xpad_ref, slab_ref, *, W, lead):
    C = x_ref.shape[1]
    HW = x_ref.shape[2]
    lbuf = xpad_ref.shape[1]

    # Zero ONLY the halo columns (lane-aligned: lead % 128 == 0, HW % 128 == 0
    # at supported shapes).  The interior [lead, lead+HW) is fully overwritten
    # below for each conv, so no full-buffer zero-fill is needed.
    halo_zeros = jnp.zeros((C, lead), jnp.bfloat16)
    xpad_ref[:, 0:lead] = halo_zeros
    xpad_ref[:, lead + HW:lbuf] = halo_zeros

    not_left = mask_ref[0:1, :]     # (1, HW) bf16: 0 where col == 0
    not_right = mask_ref[1:2, :]    # (1, HW) bf16: 0 where col == W-1

    def stage_taps():
        # Pack the 9 shifted (edge-masked) patches into the (9C, HW) slab so
        # one K = 9*C MXU matmul replaces 9 thin K = C matmuls.
        k = 0
        for dy in (-1, 0, 1):
            for dx in (-1, 0, 1):
                s = lead + dy * W + dx               # static lane offset
                patch = xpad_ref[:, s:s + HW]        # (C, HW) bf16 shifted view
                if dx == -1:
                    patch = patch * not_left         # kill row wraparound / left edge
                elif dx == 1:
                    patch = patch * not_right        # kill row wraparound / right edge
                slab_ref[k * C:(k + 1) * C, :] = patch
                k += 1

    # ---- conv1 + bias + ReLU (bf16 operands, f32 accumulation) ----
    xpad_ref[:, lead:lead + HW] = x_ref[0].astype(jnp.bfloat16)
    stage_taps()
    h = jnp.dot(w1_ref[...], slab_ref[...], preferred_element_type=jnp.float32)
    h = jnp.maximum(h + b1_ref[...], 0.0)

    # ---- conv2 (res_scale folded into w2/b2) from the SAME reused buffer ----
    xpad_ref[:, lead:lead + HW] = h.astype(jnp.bfloat16)
    stage_taps()
    res = jnp.dot(w2_ref[...], slab_ref[...], preferred_element_type=jnp.float32)
    res = res + b2_ref[...]

    # Residual add in f32, lane-dense output store.
    o_ref[0] = (res + x_ref[0].astype(jnp.float32)).astype(o_ref.dtype)


def res_block(x, w1, b1, w2, b2, *, res_scale=1.0):
    """Fused ResBlock forward.

    x:        (N, C, H, W)  activations, NCHW (same as PyTorch)
    w1, w2:   (C, C, 3, 3)  conv weights, OIHW (same as PyTorch Conv2d)
    b1, b2:   (C,)          conv biases
    Computes conv2(relu(conv1(x))) * res_scale + x with 3x3 'same' convs.
    MXU operands are bf16; accumulation / bias / ReLU / residual are f32.
    """
    N, C, H, W = x.shape
    HW = H * W
    # Lane-aligned halo: every tap slice stays in bounds and the interior
    # staging store starts at a 128-aligned lane offset.
    lead = ((W + 1 + 127) // 128) * 128
    lbuf = 2 * lead + HW

    # Free reshape (trailing dims merge) — no HBM transpose of activations.
    xf = x.reshape(N, C, HW)

    # One-time weight repack: (O, I, KH, KW) -> (O, KH, KW, I) -> (O, 9*I),
    # i.e. column index = (ky*3 + kx)*C + c_in, matching the slab row order.
    # res_scale is folded into w2/b2 (exact for power-of-two scales).
    w1p = jnp.transpose(w1, (0, 2, 3, 1)).reshape(C, 9 * C).astype(jnp.bfloat16)
    w2p = (jnp.transpose(w2, (0, 2, 3, 1)).reshape(C, 9 * C)
           * res_scale).astype(jnp.bfloat16)
    b1c = b1.reshape(C, 1).astype(jnp.float32)
    b2c = (b2 * res_scale).reshape(C, 1).astype(jnp.float32)

    # Column masks for the dx = +/-1 taps (fix flattened-spatial wraparound).
    col = jnp.arange(HW, dtype=jnp.int32) % W
    colmask = jnp.stack([(col != 0), (col != W - 1)]).astype(jnp.bfloat16)  # (2, HW)

    kernel = functools.partial(_resblock_kernel, W=W, lead=lead)

    out = pl.pallas_call(
        kernel,
        out_shape=jax.ShapeDtypeStruct((N, C, HW), x.dtype),
        grid=(N,),
        in_specs=[
            pl.BlockSpec((1, C, HW), lambda n: (n, 0, 0)),    # x, one image/step
            pl.BlockSpec((C, 9 * C), lambda n: (0, 0)),       # w1 packed (resident)
            pl.BlockSpec((C, 1), lambda n: (0, 0)),           # b1
            pl.BlockSpec((C, 9 * C), lambda n: (0, 0)),       # w2 packed (resident)
            pl.BlockSpec((C, 1), lambda n: (0, 0)),           # b2 (res_scale folded)
            pl.BlockSpec((2, HW), lambda n: (0, 0)),          # column masks
        ],
        out_specs=pl.BlockSpec((1, C, HW), lambda n: (n, 0, 0)),
        scratch_shapes=[
            pltpu.VMEM((C, lbuf), jnp.bfloat16),              # shared padded staging buf
            pltpu.VMEM((9 * C, HW), jnp.bfloat16),            # K=9C matmul slab
        ],
        compiler_params=pltpu.CompilerParams(
            dimension_semantics=("parallel",)),
    )(xf, w1p, b1c, w2p, b2c, colmask)

    return out.reshape(N, C, H, W)


def res_block_reference(x, w1, b1, w2, b2, *, res_scale=1.0, compute_dtype=None):
    """Pure-JAX reference mirroring the PyTorch ResBlock forward.

    compute_dtype lets us mirror the kernel's bf16 MXU operands (f32 accum)
    for a tight numerical comparison.
    """
    dn = ("NCHW", "OIHW", "NCHW")
    cd = compute_dtype or x.dtype
    y = jax.lax.conv_general_dilated(
        x.astype(cd), w1.astype(cd), (1, 1), "SAME", dimension_numbers=dn,
        preferred_element_type=jnp.float32)
    y = jnp.maximum(y + b1[None, :, None, None].astype(jnp.float32), 0.0)
    y = jax.lax.conv_general_dilated(
        y.astype(cd), w2.astype(cd), (1, 1), "SAME", dimension_numbers=dn,
        preferred_element_type=jnp.float32)
    y = y + b2[None, :, None, None].astype(jnp.float32)
    return (y * res_scale + x.astype(jnp.float32)).astype(x.dtype)


if __name__ == "__main__":
    key = jax.random.PRNGKey(0)
    # C=8 keeps 9*C and the slab row offsets sublane-aligned (review noted C=4
    # underfills sublanes and skews conclusions); still a small test shape.
    N, C, H, W = 2, 8, 16, 16
    res_scale = 0.5
    kx, k1, kb1, k2, kb2 = jax.random.split(key, 5)
    x = jax.random.normal(kx, (N, C, H, W), dtype=jnp.float32)
    w1 = jax.random.normal(k1, (C, C, 3, 3), dtype=jnp.float32) * 0.1
    b1 = jax.random.normal(kb1, (C,), dtype=jnp.float32) * 0.1
    w2 = jax.random.normal(k2, (C, C, 3, 3), dtype=jnp.float32) * 0.1
    b2 = jax.random.normal(kb2, (C,), dtype=jnp.float32) * 0.1

    fwd = jax.jit(functools.partial(res_block, res_scale=res_scale))
    out = jax.block_until_ready(fwd(x, w1, b1, w2, b2))
    assert out.shape == (N, C, H, W)

    # Tight check against a reference with matching bf16-operand numerics.
    ref_bf16 = res_block_reference(x, w1, b1, w2, b2, res_scale=res_scale,
                                   compute_dtype=jnp.bfloat16)
    err_bf16 = float(jnp.max(jnp.abs(out - ref_bf16)))
    assert jnp.allclose(out, ref_bf16, atol=2e-3, rtol=2e-3), err_bf16

    # Loose sanity check against the pure-f32 PyTorch-faithful reference
    # (slack accounts for bf16 MXU operand rounding).
    ref_f32 = res_block_reference(x, w1, b1, w2, b2, res_scale=res_scale)
    err_f32 = float(jnp.max(jnp.abs(out - ref_f32)))
    assert jnp.allclose(out, ref_f32, atol=6e-2, rtol=6e-2), err_f32

    print("KERNEL_OK")
</pallas_src>

<mosaic_0001>
module attributes {stable_mosaic.version = 11 : i64} {
  func.func @_resblock_kernel(%arg0: i32, %arg1: memref<1x8x256xf32, #tpu.memory_space<vmem>>, %arg2: memref<8x72xbf16, #tpu.memory_space<vmem>>, %arg3: memref<8x1xf32, #tpu.memory_space<vmem>>, %arg4: memref<8x72xbf16, #tpu.memory_space<vmem>>, %arg5: memref<8x1xf32, #tpu.memory_space<vmem>>, %arg6: memref<2x256xbf16, #tpu.memory_space<vmem>>, %arg7: memref<1x8x256xf32, #tpu.memory_space<vmem>>, %arg8: memref<8x512xbf16, #tpu.memory_space<vmem>>, %arg9: memref<72x256xbf16, #tpu.memory_space<vmem>>) attributes {dimension_semantics = [#tpu.dimension_semantics<parallel>], iteration_bounds = array<i64: 2>, scalar_prefetch = 0 : i64, scratch_operands = 2 : i64, tpu.core_type = #tpu.core_type<tc>, window_params = [{transform_indices = @transform_0, window_bounds = array<i64: 1, 8, 256>}, {pipeline_mode = #tpu.pipeline_mode<synchronous>, transform_indices = @transform_1, window_bounds = array<i64: 8, 72>}, {pipeline_mode = #tpu.pipeline_mode<synchronous>, transform_indices = @transform_2, window_bounds = array<i64: 8, 1>}, {pipeline_mode = #tpu.pipeline_mode<synchronous>, transform_indices = @transform_3, window_bounds = array<i64: 8, 72>}, {pipeline_mode = #tpu.pipeline_mode<synchronous>, transform_indices = @transform_4, window_bounds = array<i64: 8, 1>}, {pipeline_mode = #tpu.pipeline_mode<synchronous>, transform_indices = @transform_5, window_bounds = array<i64: 2, 256>}, {transform_indices = @transform_6, window_bounds = array<i64: 1, 8, 256>}]} {
    %cst = arith.constant 0.000000e+00 : bf16
    %0 = vector.broadcast %cst : bf16 to vector<8x128xbf16>
    %c0 = arith.constant 0 : index
    %c0_0 = arith.constant 0 : index
    %1 = vector.load %arg8[%c0, %c0_0] : memref<8x512xbf16, #tpu.memory_space<vmem>>, vector<8x128xbf16>
    tpu.vector_store %arg8[%c0, %c0_0], %0 {strides = array<i32>} : memref<8x512xbf16, #tpu.memory_space<vmem>>, vector<8x128xbf16>,
    %c0_1 = arith.constant 0 : index
    %c384 = arith.constant 384 : index
    %2 = vector.load %arg8[%c0_1, %c384] : memref<8x512xbf16, #tpu.memory_space<vmem>>, vector<8x128xbf16>
    tpu.vector_store %arg8[%c0_1, %c384], %0 {strides = array<i32>} : memref<8x512xbf16, #tpu.memory_space<vmem>>, vector<8x128xbf16>,
    %c0_2 = arith.constant 0 : index
    %c0_3 = arith.constant 0 : index
    %3 = vector.load %arg6[%c0_2, %c0_3] : memref<2x256xbf16, #tpu.memory_space<vmem>>, vector<1x256xbf16>
    %c1 = arith.constant 1 : index
    %c0_4 = arith.constant 0 : index
    %4 = vector.load %arg6[%c1, %c0_4] : memref<2x256xbf16, #tpu.memory_space<vmem>>, vector<1x256xbf16>
    %c0_5 = arith.constant 0 : index
    %c0_6 = arith.constant 0 : index
    %c0_7 = arith.constant 0 : index
    %5 = vector.load %arg1[%c0_5, %c0_6, %c0_7] : memref<1x8x256xf32, #tpu.memory_space<vmem>>, vector<1x8x256xf32>
    %6 = vector.shape_cast %5 : vector<1x8x256xf32> to vector<8x256xf32>
    %7 = arith.truncf %6 : vector<8x256xf32> to vector<8x256xbf16>
    %c0_8 = arith.constant 0 : index
    %c128 = arith.constant 128 : index
    %8 = vector.load %arg8[%c0_8, %c128] : memref<8x512xbf16, #tpu.memory_space<vmem>>, vector<8x256xbf16>
    tpu.vector_store %arg8[%c0_8, %c128], %7 {strides = array<i32>} : memref<8x512xbf16, #tpu.memory_space<vmem>>, vector<8x256xbf16>,
    %c0_9 = arith.constant 0 : index
    %c111 = arith.constant 111 : index
    %9 = vector.load %arg8[%c0_9, %c111] : memref<8x512xbf16, #tpu.memory_space<vmem>>, vector<8x256xbf16>
    %10 = vector.broadcast %3 : vector<1x256xbf16> to vector<8x256xbf16>
    %11 = arith.mulf %9, %10 : vector<8x256xbf16>
    %c0_10 = arith.constant 0 : index
    %c0_11 = arith.constant 0 : index
    %12 = vector.load %arg9[%c0_10, %c0_11] : memref<72x256xbf16, #tpu.memory_space<vmem>>, vector<8x256xbf16>
    tpu.vector_store %arg9[%c0_10, %c0_11], %11 {strides = array<i32>} : memref<72x256xbf16, #tpu.memory_space<vmem>>, vector<8x256xbf16>,
    %c0_12 = arith.constant 0 : index
    %c112 = arith.constant 112 : index
    %13 = vector.load %arg8[%c0_12, %c112] : memref<8x512xbf16, #tpu.memory_space<vmem>>, vector<8x256xbf16>
    %c8 = arith.constant 8 : index
    %c0_13 = arith.constant 0 : index
    %14 = vector.load %arg9[%c8, %c0_13] : memref<72x256xbf16, #tpu.memory_space<vmem>>, vector<8x256xbf16>
    tpu.vector_store %arg9[%c8, %c0_13], %13 {strides = array<i32>} : memref<72x256xbf16, #tpu.memory_space<vmem>>, vector<8x256xbf16>,
    %c0_14 = arith.constant 0 : index
    %c113 = arith.constant 113 : index
    %15 = vector.load %arg8[%c0_14, %c113] : memref<8x512xbf16, #tpu.memory_space<vmem>>, vector<8x256xbf16>
    %16 = vector.broadcast %4 : vector<1x256xbf16> to vector<8x256xbf16>
    %17 = arith.mulf %15, %16 : vector<8x256xbf16>
    %c16 = arith.constant 16 : index
    %c0_15 = arith.constant 0 : index
    %18 = vector.load %arg9[%c16, %c0_15] : memref<72x256xbf16, #tpu.memory_space<vmem>>, vector<8x256xbf16>
    tpu.vector_store %arg9[%c16, %c0_15], %17 {strides = array<i32>} : memref<72x256xbf16, #tpu.memory_space<vmem>>, vector<8x256xbf16>,
    %c0_16 = arith.constant 0 : index
    %c127 = arith.constant 127 : index
    %19 = vector.load %arg8[%c0_16, %c127] : memref<8x512xbf16, #tpu.memory_space<vmem>>, vector<8x256xbf16>
    %20 = vector.broadcast %3 : vector<1x256xbf16> to vector<8x256xbf16>
    %21 = arith.mulf %19, %20 : vector<8x256xbf16>
    %c24 = arith.constant 24 : index
    %c0_17 = arith.constant 0 : index
    %22 = vector.load %arg9[%c24, %c0_17] : memref<72x256xbf16, #tpu.memory_space<vmem>>, vector<8x256xbf16>
    tpu.vector_store %arg9[%c24, %c0_17], %21 {strides = array<i32>} : memref<72x256xbf16, #tpu.memory_space<vmem>>, vector<8x256xbf16>,
    %c0_18 = arith.constant 0 : index
    %c128_19 = arith.constant 128 : index
    %23 = vector.load %arg8[%c0_18, %c128_19] : memref<8x512xbf16, #tpu.memory_space<vmem>>, vector<8x256xbf16>
    %c32 = arith.constant 32 : index
    %c0_20 = arith.constant 0 : index
    %24 = vector.load %arg9[%c32, %c0_20] : memref<72x256xbf16, #tpu.memory_space<vmem>>, vector<8x256xbf16>
    tpu.vector_store %arg9[%c32, %c0_20], %23 {strides = array<i32>} : memref<72x256xbf16, #tpu.memory_space<vmem>>, vector<8x256xbf16>,
    %c0_21 = arith.constant 0 : index
    %c129 = arith.constant 129 : index
    %25 = vector.load %arg8[%c0_21, %c129] : memref<8x512xbf16, #tpu.memory_space<vmem>>, vector<8x256xbf16>
    %26 = vector.broadcast %4 : vector<1x256xbf16> to vector<8x256xbf16>
    %27 = arith.mulf %25, %26 : vector<8x256xbf16>
    %c40 = arith.constant 40 : index
    %c0_22 = arith.constant 0 : index
    %28 = vector.load %arg9[%c40, %c0_22] : memref<72x256xbf16, #tpu.memory_space<vmem>>, vector<8x256xbf16>
    tpu.vector_store %arg9[%c40, %c0_22], %27 {strides = array<i32>} : memref<72x256xbf16, #tpu.memory_space<vmem>>, vector<8x256xbf16>,
    %c0_23 = arith.constant 0 : index
    %c143 = arith.constant 143 : index
    %29 = vector.load %arg8[%c0_23, %c143] : memref<8x512xbf16, #tpu.memory_space<vmem>>, vector<8x256xbf16>
    %30 = vector.broadcast %3 : vector<1x256xbf16> to vector<8x256xbf16>
    %31 = arith.mulf %29, %30 : vector<8x256xbf16>
    %c48 = arith.constant 48 : index
    %c0_24 = arith.constant 0 : index
    %32 = vector.load %arg9[%c48, %c0_24] : memref<72x256xbf16, #tpu.memory_space<vmem>>, vector<8x256xbf16>
    tpu.vector_store %arg9[%c48, %c0_24], %31 {strides = array<i32>} : memref<72x256xbf16, #tpu.memory_space<vmem>>, vector<8x256xbf16>,
    %c0_25 = arith.constant 0 : index
    %c144 = arith.constant 144 : index
    %33 = vector.load %arg8[%c0_25, %c144] : memref<8x512xbf16, #tpu.memory_space<vmem>>, vector<8x256xbf16>
    %c56 = arith.constant 56 : index
    %c0_26 = arith.constant 0 : index
    %34 = vector.load %arg9[%c56, %c0_26] : memref<72x256xbf16, #tpu.memory_space<vmem>>, vector<8x256xbf16>
    tpu.vector_store %arg9[%c56, %c0_26], %33 {strides = array<i32>} : memref<72x256xbf16, #tpu.memory_space<vmem>>, vector<8x256xbf16>,
    %c0_27 = arith.constant 0 : index
    %c145 = arith.constant 145 : index
    %35 = vector.load %arg8[%c0_27, %c145] : memref<8x512xbf16, #tpu.memory_space<vmem>>, vector<8x256xbf16>
    %36 = vector.broadcast %4 : vector<1x256xbf16> to vector<8x256xbf16>
    %37 = arith.mulf %35, %36 : vector<8x256xbf16>
    %c64 = arith.constant 64 : index
    %c0_28 = arith.constant 0 : index
    %38 = vector.load %arg9[%c64, %c0_28] : memref<72x256xbf16, #tpu.memory_space<vmem>>, vector<8x256xbf16>
    tpu.vector_store %arg9[%c64, %c0_28], %37 {strides = array<i32>} : memref<72x256xbf16, #tpu.memory_space<vmem>>, vector<8x256xbf16>,
    %c0_29 = arith.constant 0 : index
    %c0_30 = arith.constant 0 : index
    %39 = vector.load %arg2[%c0_29, %c0_30] : memref<8x72xbf16, #tpu.memory_space<vmem>>, vector<8x72xbf16>
    %c0_31 = arith.constant 0 : index
    %c0_32 = arith.constant 0 : index
    %40 = vector.load %arg9[%c0_31, %c0_32] : memref<72x256xbf16, #tpu.memory_space<vmem>>, vector<72x256xbf16>
    %cst_33 = arith.constant dense<0.000000e+00> : vector<8x256xf32>
    %41 = tpu.matmul %39, %40, %cst_33 {dimension_numbers = #tpu.dot_dimension_numbers<[1], [0], [0], [1], [0, 0, 1, 1], [], []>} : vector<8x72xbf16>, vector<72x256xbf16>, vector<8x256xf32> -> vector<8x256xf32>
    %c0_34 = arith.constant 0 : index
    %c0_35 = arith.constant 0 : index
    %42 = vector.load %arg3[%c0_34, %c0_35] : memref<8x1xf32, #tpu.memory_space<vmem>>, vector<8x1xf32>
    %43 = vector.broadcast %42 : vector<8x1xf32> to vector<8x256xf32>
    %44 = arith.addf %41, %43 : vector<8x256xf32>
    %cst_36 = arith.constant 0.000000e+00 : f32
    %45 = vector.broadcast %cst_36 : f32 to vector<8x256xf32>
    %46 = arith.maximumf %44, %45 : vector<8x256xf32>
    %47 = arith.truncf %46 : vector<8x256xf32> to vector<8x256xbf16>
    %c0_37 = arith.constant 0 : index
    %c128_38 = arith.constant 128 : index
    %48 = vector.load %arg8[%c0_37, %c128_38] : memref<8x512xbf16, #tpu.memory_space<vmem>>, vector<8x256xbf16>
    tpu.vector_store %arg8[%c0_37, %c128_38], %47 {strides = array<i32>} : memref<8x512xbf16, #tpu.memory_space<vmem>>, vector<8x256xbf16>,
    %c0_39 = arith.constant 0 : index
    %c111_40 = arith.constant 111 : index
    %49 = vector.load %arg8[%c0_39, %c111_40] : memref<8x512xbf16, #tpu.memory_space<vmem>>, vector<8x256xbf16>
    %50 = vector.broadcast %3 : vector<1x256xbf16> to vector<8x256xbf16>
    %51 = arith.mulf %49, %50 : vector<8x256xbf16>
    %c0_41 = arith.constant 0 : index
    %c0_42 = arith.constant 0 : index
    %52 = vector.load %arg9[%c0_41, %c0_42] : memref<72x256xbf16, #tpu.memory_space<vmem>>, vector<8x256xbf16>
    tpu.vector_store %arg9[%c0_41, %c0_42], %51 {strides = array<i32>} : memref<72x256xbf16, #tpu.memory_space<vmem>>, vector<8x256xbf16>,
    %c0_43 = arith.constant 0 : index
    %c112_44 = arith.constant 112 : index
    %53 = vector.load %arg8[%c0_43, %c112_44] : memref<8x512xbf16, #tpu.memory_space<vmem>>, vector<8x256xbf16>
    %c8_45 = arith.constant 8 : index
    %c0_46 = arith.constant 0 : index
    %54 = vector.load %arg9[%c8_45, %c0_46] : memref<72x256xbf16, #tpu.memory_space<vmem>>, vector<8x256xbf16>
    tpu.vector_store %arg9[%c8_45, %c0_46], %53 {strides = array<i32>} : memref<72x256xbf16, #tpu.memory_space<vmem>>, vector<8x256xbf16>,
    %c0_47 = arith.constant 0 : index
    %c113_48 = arith.constant 113 : index
    %55 = vector.load %arg8[%c0_47, %c113_48] : memref<8x512xbf16, #tpu.memory_space<vmem>>, vector<8x256xbf16>
    %56 = vector.broadcast %4 : vector<1x256xbf16> to vector<8x256xbf16>
    %57 = arith.mulf %55, %56 : vector<8x256xbf16>
    %c16_49 = arith.constant 16 : index
    %c0_50 = arith.constant 0 : index
    %58 = vector.load %arg9[%c16_49, %c0_50] : memref<72x256xbf16, #tpu.memory_space<vmem>>, vector<8x256xbf16>
    tpu.vector_store %arg9[%c16_49, %c0_50], %57 {strides = array<i32>} : memref<72x256xbf16, #tpu.memory_space<vmem>>, vector<8x256xbf16>,
    %c0_51 = arith.constant 0 : index
    %c127_52 = arith.constant 127 : index
    %59 = vector.load %arg8[%c0_51, %c127_52] : memref<8x512xbf16, #tpu.memory_space<vmem>>, vector<8x256xbf16>
    %60 = vector.broadcast %3 : vector<1x256xbf16> to vector<8x256xbf16>
    %61 = arith.mulf %59, %60 : vector<8x256xbf16>
    %c24_53 = arith.constant 24 : index
    %c0_54 = arith.constant 0 : index
    %62 = vector.load %arg9[%c24_53, %c0_54] : memref<72x256xbf16, #tpu.memory_space<vmem>>, vector<8x256xbf16>
    tpu.vector_store %arg9[%c24_53, %c0_54], %61 {strides = array<i32>} : memref<72x256xbf16, #tpu.memory_space<vmem>>, vector<8x256xbf16>,
    %c0_55 = arith.constant 0 : index
    %c128_56 = arith.constant 128 : index
    %63 = vector.load %arg8[%c0_55, %c128_56] : memref<8x512xbf16, #tpu.memory_space<vmem>>, vector<8x256xbf16>
    %c32_57 = arith.constant 32 : index
    %c0_58 = arith.constant 0 : index
    %64 = vector.load %arg9[%c32_57, %c0_58] : memref<72x256xbf16, #tpu.memory_space<vmem>>, vector<8x256xbf16>
    tpu.vector_store %arg9[%c32_57, %c0_58], %63 {strides = array<i32>} : memref<72x256xbf16, #tpu.memory_space<vmem>>, vector<8x256xbf16>,
    %c0_59 = arith.constant 0 : index
    %c129_60 = arith.constant 129 : index
    %65 = vector.load %arg8[%c0_59, %c129_60] : memref<8x512xbf16, #tpu.memory_space<vmem>>, vector<8x256xbf16>
    %66 = vector.broadcast %4 : vector<1x256xbf16> to vector<8x256xbf16>
    %67 = arith.mulf %65, %66 : vector<8x256xbf16>
    %c40_61 = arith.constant 40 : index
    %c0_62 = arith.constant 0 : index
    %68 = vector.load %arg9[%c40_61, %c0_62] : memref<72x256xbf16, #tpu.memory_space<vmem>>, vector<8x256xbf16>
    tpu.vector_store %arg9[%c40_61, %c0_62], %67 {strides = array<i32>} : memref<72x256xbf16, #tpu.memory_space<vmem>>, vector<8x256xbf16>,
    %c0_63 = arith.constant 0 : index
    %c143_64 = arith.constant 143 : index
    %69 = vector.load %arg8[%c0_63, %c143_64] : memref<8x512xbf16, #tpu.memory_space<vmem>>, vector<8x256xbf16>
    %70 = vector.broadcast %3 : vector<1x256xbf16> to vector<8x256xbf16>
    %71 = arith.mulf %69, %70 : vector<8x256xbf16>
    %c48_65 = arith.constant 48 : index
    %c0_66 = arith.constant 0 : index
    %72 = vector.load %arg9[%c48_65, %c0_66] : memref<72x256xbf16, #tpu.memory_space<vmem>>, vector<8x256xbf16>
    tpu.vector_store %arg9[%c48_65, %c0_66], %71 {strides = array<i32>} : memref<72x256xbf16, #tpu.memory_space<vmem>>, vector<8x256xbf16>,
    %c0_67 = arith.constant 0 : index
    %c144_68 = arith.constant 144 : index
    %73 = vector.load %arg8[%c0_67, %c144_68] : memref<8x512xbf16, #tpu.memory_space<vmem>>, vector<8x256xbf16>
    %c56_69 = arith.constant 56 : index
    %c0_70 = arith.constant 0 : index
    %74 = vector.load %arg9[%c56_69, %c0_70] : memref<72x256xbf16, #tpu.memory_space<vmem>>, vector<8x256xbf16>
    tpu.vector_store %arg9[%c56_69, %c0_70], %73 {strides = array<i32>} : memref<72x256xbf16, #tpu.memory_space<vmem>>, vector<8x256xbf16>,
    %c0_71 = arith.constant 0 : index
    %c145_72 = arith.constant 145 : index
    %75 = vector.load %arg8[%c0_71, %c145_72] : memref<8x512xbf16, #tpu.memory_space<vmem>>, vector<8x256xbf16>
    %76 = vector.broadcast %4 : vector<1x256xbf16> to vector<8x256xbf16>
    %77 = arith.mulf %75, %76 : vector<8x256xbf16>
    %c64_73 = arith.constant 64 : index
    %c0_74 = arith.constant 0 : index
    %78 = vector.load %arg9[%c64_73, %c0_74] : memref<72x256xbf16, #tpu.memory_space<vmem>>, vector<8x256xbf16>
    tpu.vector_store %arg9[%c64_73, %c0_74], %77 {strides = array<i32>} : memref<72x256xbf16, #tpu.memory_space<vmem>>, vector<8x256xbf16>,
    %c0_75 = arith.constant 0 : index
    %c0_76 = arith.constant 0 : index
    %79 = vector.load %arg4[%c0_75, %c0_76] : memref<8x72xbf16, #tpu.memory_space<vmem>>, vector<8x72xbf16>
    %c0_77 = arith.constant 0 : index
    %c0_78 = arith.constant 0 : index
    %80 = vector.load %arg9[%c0_77, %c0_78] : memref<72x256xbf16, #tpu.memory_space<vmem>>, vector<72x256xbf16>
    %cst_79 = arith.constant dense<0.000000e+00> : vector<8x256xf32>
    %81 = tpu.matmul %79, %80, %cst_79 {dimension_numbers = #tpu.dot_dimension_numbers<[1], [0], [0], [1], [0, 0, 1, 1], [], []>} : vector<8x72xbf16>, vector<72x256xbf16>, vector<8x256xf32> -> vector<8x256xf32>
    %c0_80 = arith.constant 0 : index
    %c0_81 = arith.constant 0 : index
    %82 = vector.load %arg5[%c0_80, %c0_81] : memref<8x1xf32, #tpu.memory_space<vmem>>, vector<8x1xf32>
    %83 = vector.broadcast %82 : vector<8x1xf32> to vector<8x256xf32>
    %84 = arith.addf %81, %83 : vector<8x256xf32>
    %c0_82 = arith.constant 0 : index
    %c0_83 = arith.constant 0 : index
    %c0_84 = arith.constant 0 : index
    %85 = vector.load %arg1[%c0_82, %c0_83, %c0_84] : memref<1x8x256xf32, #tpu.memory_space<vmem>>, vector<1x8x256xf32>
    %86 = vector.shape_cast %85 : vector<1x8x256xf32> to vector<8x256xf32>
    %87 = arith.addf %84, %86 : vector<8x256xf32>
    %c0_85 = arith.constant 0 : index
    %c0_86 = arith.constant 0 : index
    %c0_87 = arith.constant 0 : index
    %88 = vector.load %arg7[%c0_85, %c0_86, %c0_87] : memref<1x8x256xf32, #tpu.memory_space<vmem>>, vector<1x8x256xf32>
    %89 = vector.shape_cast %88 : vector<1x8x256xf32> to vector<8x256xf32>
    %90 = vector.shape_cast %87 : vector<8x256xf32> to vector<1x8x256xf32>
    tpu.vector_store %arg7[%c0_85, %c0_86, %c0_87], %90 {strides = array<i32>} : memref<1x8x256xf32, #tpu.memory_space<vmem>>, vector<1x8x256xf32>,
    return
  }
  func.func @transform_0(%arg0: i32) -> (i32, i32, i32) {
    %c0_i32 = arith.constant 0 : i32
    %c0_i32_0 = arith.constant 0 : i32
    %c0_i32_1 = arith.constant 0 : i32
    return %arg0, %c0_i32, %c0_i32_0 : i32, i32, i32
  }
  func.func @transform_1(%arg0: i32) -> (i32, i32) {
    %c0_i32 = arith.constant 0 : i32
    %c0_i32_0 = arith.constant 0 : i32
    %c0_i32_1 = arith.constant 0 : i32
    return %c0_i32, %c0_i32_0 : i32, i32
  }
  func.func @transform_2(%arg0: i32) -> (i32, i32) {
    %c0_i32 = arith.constant 0 : i32
    %c0_i32_0 = arith.constant 0 : i32
    %c0_i32_1 = arith.constant 0 : i32
    return %c0_i32, %c0_i32_0 : i32, i32
  }
  func.func @transform_3(%arg0: i32) -> (i32, i32) {
    %c0_i32 = arith.constant 0 : i32
    %c0_i32_0 = arith.constant 0 : i32
    %c0_i32_1 = arith.constant 0 : i32
    return %c0_i32, %c0_i32_0 : i32, i32
  }
  func.func @transform_4(%arg0: i32) -> (i32, i32) {
    %c0_i32 = arith.constant 0 : i32
    %c0_i32_0 = arith.constant 0 : i32
    %c0_i32_1 = arith.constant 0 : i32
    return %c0_i32, %c0_i32_0 : i32, i32
  }
  func.func @transform_5(%arg0: i32) -> (i32, i32) {
    %c0_i32 = arith.constant 0 : i32
    %c0_i32_0 = arith.constant 0 : i32
    %c0_i32_1 = arith.constant 0 : i32
    return %c0_i32, %c0_i32_0 : i32, i32
  }
  func.func @transform_6(%arg0: i32) -> (i32, i32, i32) {
    %c0_i32 = arith.constant 0 : i32
    %c0_i32_0 = arith.constant 0 : i32
    %c0_i32_1 = arith.constant 0 : i32
    return %arg0, %c0_i32, %c0_i32_0 : i32, i32, i32
  }
}

</mosaic_0001>

<bundles_post_ra>
// kernel: res_block.1
= control target key start
LH: loop header
LB: loop body
LE: loop exit
PB: predicated region body
PF: predicated region fallthrough
CT: control target
= control target key end

     0   :  { %s1133_s21 = smov 0   ;;  %s1374_s0 = inlined_call_operand.vmem [shape: f32[2,8,256], index: 0, kind: input, shape index: {}]   ;;  %s1375_s1 = inlined_call_operand.vmem [shape: bf16[8,72], index: 1, kind: input, shape index: {}]   ;;  %s1376_s2 = inlined_call_operand.vmem [shape: f32[8,1], index: 2, kind: input, shape index: {}]   ;;  %s1377_s3 = inlined_call_operand.vmem [shape: bf16[8,72], index: 3, kind: input, shape index: {}]   ;;  %s1378_s4 = inlined_call_operand.vmem [shape: f32[8,1], index: 4, kind: input, shape index: {}]   ;;  %s1379_s5 = inlined_call_operand.vmem [shape: bf16[2,256], index: 5, kind: input, shape index: {}]   ;;  %s1380_s6 = inlined_call_operand.vmem [shape: f32[2,8,256], index: 6, kind: output, shape index: {}]  }
   0x1 LB: > { %s935_s22 = sadd.s32 4294967295, %s1087_s21   ;;  %p939_p0 = scmp.ge.s32.totalorder %s1087_s21, 1  ;;  %s1087_s21 = sphi %s1133_s21, %s16_s21  }
   0x2   : > { %p212_p1 = scmp.lt.s32.totalorder %s1087_s21, 3 }
   0x4   : > { %p213_p2 = pnand %p939_p0, %p212_p1 }
   0x5   : > { %p242_p3 = scmp.lt.s32.totalorder (!%p213_p2), %s935_s22, 1  ;;  %s1089_s29 = smov (!%p213_p2), 127  }
   0x6   : > { %216 = sbr.rel (%p213_p2) target bundleno = 774 (0x306), region = 44  ;;  %s1090_s30 = smov (!%p213_p2), 111  }
   0x7   : > { %s1091_s7 = smov (!%p213_p2), 17   ;;  %s1092_s8 = smov (!%p213_p2), 1  }
   0x8   : > { %s1093_s9 = smov (!%p213_p2), 15   ;;  %s1094_s10 = smov (!%p213_p2), 113  }
   0x9   : > { %s1095_s11 = smov (!%p213_p2), 112   ;;  %s1097_s12 = smov (!%p213_p2), 16  }
   0xb   : > { %v255_v0 = vld [vmem:[%s1379_s5] sm:$0x3]  ;;  %s1382_s22 = smov (!%p242_p3, %s935_s22), 1  ;;  %v1096_v24 = vmov 0   ;;  %vm378_vm0 = vcmask 1039360   ;;  %vm365_vm1 = vcmask 121856  }
   0xc   : > { %263 = vst [vmem:[#allocation1] ss:$9 sm:$0xff] %v255_v0  ;;  %s1014_s25 = sshll.u32 %s1382_s22, 4  ;;  %1079 = vset.pattern.permute.xlu1 %v1096_v24  ;;  %1080 = vset.pattern.permute.xlu0 %v1096_v24  ;;  %vm303_vm2 = vcmask 138240   ;;  %vm346_vm3 = vcmask 924672   ;;  %vm283_vm4 = vcmask 908288  }
   0xd   : > { %s246_s28 = scalar_lea.vmem %s1374_s0, %s1014_s25  ;;  %254 = vst [vmem:[#allocation2 + $0xc] sm:$0xf] %v1096_v24  ;;  %vm397_vm5 = vcmask 7168   ;;  %vm301_vm6 = vcmask 1043456   ;;  %vm478_vm7 = vcmask 916480   ;;  %vm318_vm8 = vcmask 130048   ;;  %s251_s26 = scalar_lea.vmem %s1380_s6, %s1014_s25 }
   0xe   : > { %v1152_v5 = vld [vmem:[%s246_s28] sm:$0xff]  ;;  %v1154_v6 = vld [vmem:[%s246_s28 + $0x8] sm:$0xff]  ;;  %253 = vst [vmem:[#allocation2] sm:$0xf] %v1096_v24  ;;  %vm575_vm9 = vcmask 588800  }
   0xf   : > { %v1158_v7 = vpack.c.bf16 %v1154_v6, %v1152_v5 }
  0x11   : > { %259 = vst [vmem:[#allocation2 + $0x4] sm:$0xff] %v1158_v7  ;;  %v437_v48 = vunpack.c.l.bf16 %v1158_v7  ;;  %v438_v50 = vunpack.c.h.bf16 %v1158_v7 }
  0x12   : > { %402 = vst [vmem:[#allocation3 + $0x20] sm:$0xff] %v1158_v7 }
  0x13   : > { %v264_v1 = vld [vmem:[#allocation1] sm:$0xff]  ;;  %v265_v2 = vld [vmem:[#allocation1 + $0x9] sm:$0xff] }
  0x14   : > { %324 = vst [vmem:[#allocation1] ss:$9 sm:$0xff] %v255_v0  ;;  %v266_v3 = vpack.i.b16 %v264_v1, %v264_v1  ;;  %v269_v4 = vpack.i.b16 %v265_v2, %v265_v2  ;;  %v468_v25 = vld [vmem:[#allocation2 + $0xc] sm:$0xf] }
  0x16   : > { %v268_v8 = vperm.slane %v266_v3, 0  ;;  %v271_v9 = vperm.slane %v269_v4, 0 }
  0x18   : > { %v275_v10 = vunpack.c.l.bf16 %v268_v8  ;;  %v276_v11 = vunpack.c.l.bf16 %v271_v9  ;;  %v483_v27 = vld [vmem:[#allocation2 + $0x8] sm:$0xff]   ;;  %v1175_v31 = vld [vmem:[#allocation2] sm:$0xff] }
  0x19   : > { %v486_v30 = vunpack.c.h.bf16 %v483_v27  ;;  %v1182_v35 = vunpack.c.l.bf16 %v1175_v31  ;;  %v1185_v36 = vunpack.c.h.bf16 %v1175_v31  ;;  %v436_v39 = vld [vmem:[#allocation2 + $0x8] sm:$0xff]   ;;  %v337_v52 = vunpack.c.l.bf16 %v483_v27 }
  0x1a   : > { %v1069_v12 = vpack.i.bf16 %v276_v11, %v275_v10  ;;  %v439_v43 = vunpack.c.h.bf16 %v436_v39  ;;  %v404_v51 = vld [vmem:[#allocation2 + $0x8] sm:$0xff]   ;;  %v373_v58 = vunpack.c.l.bf16 %v436_v39 }
  0x1b   : > { %v325_v13 = vld [vmem:[#allocation1] sm:$0xff]  ;;  %v326_v14 = vld [vmem:[#allocation1 + $0x9] sm:$0xff]  ;;  %v407_v61 = vunpack.c.h.bf16 %v404_v51  ;;  %v274_v9 = vunpack.c.l.bf16 %v404_v51 }
  0x1c   : > { %v327_v15 = vshrl.u32 %v325_v13, 16  ;;  %v331_v16 = vshrl.u32 %v326_v14, 16  ;;  %1070 = vrot.lane.b32.xlu2 %v1069_v12, %s1089_s29 }
  0x1e   : > { %v328_v17 = vpack.i.b16 %v327_v15, %v327_v15  ;;  %v332_v18 = vpack.i.b16 %v331_v16, %v331_v16 }
  0x20   : > { %v330_v19 = vperm.slane %v328_v17, 0  ;;  %v334_v20 = vperm.slane %v332_v18, 0 }
  0x22   : > { %v338_v21 = vunpack.c.l.bf16 %v330_v19  ;;  %v339_v22 = vunpack.c.l.bf16 %v334_v20 }
  0x24   : > { %v1049_v23 = vpack.i.bf16 %v339_v22, %v338_v21  ;;  %1075 = vrot.lane.b32.xlu2 %v1069_v12, %s1090_s30 }
  0x26   : > { %1050 = vrot.lane.b32.xlu0 %v1049_v23, %s1091_s7  ;;  %1060 = vrot.lane.b32.xlu1 %v1049_v23, %s1092_s8 }
  0x2c   : > { %473 = vrot.lane.b32.xlu2 %v468_v25, %s1095_s11 }
  0x2e   : > { %1055 = vrot.lane.b32.xlu0 %v1069_v12, %s1093_s9  ;;  %1065 = vrot.lane.b32.xlu1 %v1049_v23, %s1094_s10 }
  0x36   : > { %471 = vrot.lane.b32.xlu1 %v1158_v7, %s1095_s11 }
  0x76   : > { %v1071_v26 = vpop.permute.xlu2 %1070 }
  0x77   : > { %v1171_v28 = vunpack.i.h.bf16 %v1071_v26  ;;  %v1173_v29 = vunpack.i.l.bf16 %v1071_v26 }
  0x79   : > { %v1190_v37 = vsel %vm378_vm0, %v1173_v29, %v1171_v28  ;;  %v383_v41 = vmul.f32 %v1173_v29, %v1182_v35  ;;  %v385_v0 = vmul.f32 %v1171_v28, %v373_v58 }
  0x7a   : > { %v384_v42 = vmul.f32 %v1190_v37, %v1185_v36 }
  0x7b   : > { %v387_v10 = vpack.c.bf16 %v385_v0, %v385_v0 }
  0x7c   : > { %v386_v49 = vpack.c.bf16 %v384_v42, %v383_v41  ;;  %v757_v41 = vld [vmem:[#allocation2 + $0xc] sm:$0xf]  ;;  %v308_v42 = vld [vmem:[#allocation2 + $0x8] sm:$0xf] }
  0x7e   : > { %v1076_v1 = vpop.permute.xlu2 %1075 }
  0x7f   : > { %v1227_v8 = vunpack.i.h.bf16 %v1076_v1  ;;  %v1243_v15 = vunpack.i.l.bf16 %v1076_v1 }
  0x81   : > { %v290_v14 = vmul.f32 %v1227_v8, %v274_v9  ;;  %v1254_v21 = vsel %vm283_vm4, %v1243_v15, %v1227_v8  ;;  %v288_v24 = vmul.f32 %v1243_v15, %v1182_v35 }
  0x82   : > { %v289_v25 = vmul.f32 %v1185_v36, %v1254_v21 }
  0x83   : > { %v292_v20 = vpack.c.bf16 %v290_v14, %v290_v14 }
  0x84   : > { %v291_v27 = vpack.c.bf16 %v289_v25, %v288_v24 }
  0x98   : > { %v1051_v32 = vpop.permute.xlu0 %1050  ;;  %v1177_v33 = vpop.permute.xlu1 %1060 }
  0x99   : > { %v1179_v34 = vunpack.i.h.bf16 %v1051_v32  ;;  %v1215_v59 = vunpack.i.h.bf16 %v1177_v33  ;;  %v1223_v3 = vunpack.i.l.bf16 %v1051_v32  ;;  %v1264_v26 = vunpack.i.l.bf16 %v1177_v33 }
  0x9b   : > { %v498_v38 = vmul.f32 %v1179_v34, %v486_v30  ;;  %v419_v2 = vmul.f32 %v1215_v59, %v407_v61  ;;  %v1232_v12 = vsel %vm303_vm2, %v1223_v3, %v1179_v34  ;;  %v496_v16 = vmul.f32 %v1223_v3, %v437_v48  ;;  %v721_v30 = vld [vmem:[#allocation2 + $0xc] sm:$0xf] }
  0x9c   : > { %v497_v17 = vmul.f32 %v1232_v12, %v438_v50  ;;  %v1269_v32 = vsel %vm397_vm5, %v1264_v26, %v1215_v59 }
  0x9d   : > { %v500_v40 = vpack.c.bf16 %v498_v38, %v498_v38  ;;  %v421_v11 = vpack.c.bf16 %v419_v2, %v419_v2  ;;  %v724_v38 = vunpack.c.l.bf16 %v721_v30  ;;  %v418_v33 = vmul.f32 %v438_v50, %v1269_v32 }
  0x9e   : > { %v499_v22 = vpack.c.bf16 %v497_v17, %v496_v16 }
  0x9f   : > { %505 = vrot.lane.b32.xlu1 %v500_v40, %s1090_s30 }
  0xa0   : > { %v1056_v44 = vpop.permute.xlu0 %1055  ;;  %v1066_v45 = vpop.permute.xlu1 %1065 }
  0xa1   : > { %v1198_v46 = vunpack.i.h.bf16 %v1056_v44  ;;  %v1200_v47 = vunpack.i.l.bf16 %v1056_v44  ;;  %v1209_v54 = vunpack.i.h.bf16 %v1066_v45  ;;  %v1225_v4 = vunpack.i.l.bf16 %v1066_v45 }
  0xa3   : > { %v1207_v53 = vsel %vm365_vm1, %v1200_v47, %v1198_v46  ;;  %v451_v55 = vmul.f32 %v1198_v46, %v439_v43  ;;  %v449_v56 = vmul.f32 %v1200_v47, %v437_v48  ;;  %v353_v63 = vmul.f32 %v1209_v54, %v337_v52 }
  0xa4   : > { %v450_v57 = vmul.f32 %v1207_v53, %v438_v50  ;;  %v1237_v13 = vsel %vm346_vm3, %v1225_v4, %v1209_v54  ;;  %v351_v18 = vmul.f32 %v1225_v4, %v1182_v35  ;;  %v417_v35 = vmul.f32 %v1264_v26, %v437_v48  ;;  %v474_v50 = vpop.permute.xlu2 %473 }
  0xa5   : > { %v453_v60 = vpack.c.bf16 %v451_v55, %v451_v55  ;;  %v355_v7 = vpack.c.bf16 %v353_v63, %v353_v63  ;;  %v352_v19 = vmul.f32 %v1185_v36, %v1237_v13  ;;  %v727_v36 = vmul.f32 %v1198_v46, %v724_v38 }
  0xa6   : > { %v452_v62 = vpack.c.bf16 %v450_v57, %v449_v56  ;;  %v420_v39 = vpack.c.bf16 %v418_v33, %v417_v35  ;;  %v760_v43 = vunpack.c.l.bf16 %v757_v41  ;;  %v476_v51 = vrot.slane %v474_v50, 4 }
  0xa7   : > { %458 = vrot.lane.b32.xlu0 %v453_v60, %s1094_s10  ;;  %390 = vrot.lane.b32.xlu1 %v386_v49, %s1092_s8  ;;  %v354_v23 = vpack.c.bf16 %v352_v19, %v351_v18  ;;  %v729_v40 = vpack.c.bf16 %v727_v36, %v727_v36 }
  0xa8   : > { %456 = vrot.lane.b32.xlu2 %v452_v62, %s1094_s10  ;;  %v763_v44 = vmul.f32 %v1179_v34, %v760_v43  ;;  %v472_v52 = vpop.permute.xlu1 %471 }
  0xa9   : > { %v475_v55 = vrot.slane %v472_v52, 4 }
  0xaa   : > { %v765_v45 = vpack.c.bf16 %v763_v44, %v763_v44 }
  0xab   : > { %v477_v56 = vsel %vm301_vm6, %v475_v55, %v476_v51 }
  0xac   : > { %v479_v34 = vsel %vm478_vm7, %v472_v52, %v477_v56 }
  0xad   : > { %481 = vst [vmem:[#allocation3 + $0x38] sm:$0xff] %v479_v34 }
  0xaf   : > { %426 = vrot.lane.b32.xlu1 %v421_v11, %s1089_s29  ;;  %360 = vrot.lane.b32.xlu0 %v355_v7, %s1093_s9 }
  0xb0   : > { %392 = vrot.lane.b32.xlu2 %v387_v10, %s1092_s8 }
  0xb4   : > { %v972_v43 = vld [vmem:[#allocation3 + $0x38] sm:$0xf0] }
  0xb7   : > { %503 = vrot.lane.b32.xlu0 %v499_v22, %s1090_s30  ;;  %297 = vrot.lane.b32.xlu1 %v292_v20, %s1091_s7 }
  0xb8   : > { %358 = vrot.lane.b32.xlu2 %v354_v23, %s1093_s9 }
  0xbf   : > { %295 = vrot.lane.b32.xlu0 %v291_v27, %s1091_s7 }
  0xc0   : > { %311 = vrot.lane.b32.xlu2 %v1175_v31, %s1097_s12  ;;  %v699_v31 = vld [vmem:[#allocation2 + $0xc] sm:$0xf] }
  0xc1   : > { %v702_v48 = vunpack.c.l.bf16 %v699_v31 }
  0xc3   : > { %v705_v46 = vmul.f32 %v1215_v59, %v702_v48 }
  0xc5   : > { %v707_v49 = vpack.c.bf16 %v705_v46, %v705_v46  ;;  %v524_v46 = vld [vmem:[%s1376_s2] sm:$0xff] }
  0xc6   : > { %527 = vperm.xlu1 %1079, %v524_v46  }
  0xc7   : > { %424 = vrot.lane.b32.xlu0 %v420_v39, %s1089_s29 }
  0xc8   : > { %734 = vrot.lane.b32.xlu2 %v729_v40, %s1094_s10 }
  0xcf   : > { %313 = vrot.lane.b32.xlu0 %v308_v42, %s1097_s12  ;;  %v1023_v42 = vld [vmem:[#allocation3 + $0x34] sm:$0xf0] }
  0xd7   : > { %770 = vrot.lane.b32.xlu0 %v765_v45, %s1090_s30 }
  0xdf   : > { %712 = vrot.lane.b32.xlu0 %v707_v49, %s1089_s29 }
 0x102   : > { %v457_v57 = vpop.permute.xlu2 %456 }
 0x103   : > { %v460_v59 = vrot.slane %v457_v57, 4 }
 0x10a   : > { %v393_v60 = vpop.permute.xlu2 %392 }
 0x10b   : > { %v395_v63 = vrot.slane %v393_v60, 4 }
 0x111   : > { %v506_v58 = vpop.permute.xlu1 %505 }
 0x112   : > { %v359_v11 = vpop.permute.xlu2 %358  ;;  %v508_v23 = vrot.slane %v506_v58, 4 }
 0x113   : > { %v362_v16 = vrot.slane %v359_v11, 4 }
 0x119   : > { %v459_v61 = vpop.permute.xlu0 %458  ;;  %v391_v62 = vpop.permute.xlu1 %390 }
 0x11a   : > { %v461_v0 = vrot.slane %v459_v61, 4  ;;  %v394_v1 = vrot.slane %v391_v62, 4  ;;  %v312_v60 = vpop.permute.xlu2 %311 }
 0x11b   : > { %v315_v61 = vrot.slane %v312_v60, 4 }
 0x11c   : > { %v462_v2 = vsel %vm301_vm6, %v460_v59, %v461_v0  ;;  %v396_v7 = vsel %vm301_vm6, %v394_v1, %v395_v63  ;;  %v962_v63 = vld [vmem:[#allocation3 + $0x20] sm:$0xf]  ;;  %v1020_v0 = vld [vmem:[#allocation3 + $0x24] sm:$0xf] }
 0x11d   : > { %v464_v9 = vsel %vm346_vm3, %v457_v57, %v462_v2  ;;  %v398_v10 = vsel %vm397_vm5, %v391_v62, %v396_v7 }
 0x11e   : > { %466 = vst [vmem:[#allocation3 + $0x30] sm:$0xff] %v464_v9 }
 0x11f   : > { %400 = vst [vmem:[#allocation3 + $0x18] sm:$0xff] %v398_v10 }
 0x121   : > { %v361_v14 = vpop.permute.xlu0 %360  ;;  %v427_v19 = vpop.permute.xlu1 %426 }
 0x122   : > { %v363_v17 = vrot.slane %v361_v14, 4  ;;  %v429_v56 = vrot.slane %v427_v19, 4 }
 0x124   : > { %v364_v18 = vsel %vm301_vm6, %v362_v16, %v363_v17 }
 0x125   : > { %v366_v20 = vsel %vm365_vm1, %v359_v11, %v364_v18  ;;  %v970_v41 = vld [vmem:[#allocation3 + $0x30] sm:$0xf]  ;;  %v1022_v48 = vld [vmem:[#allocation3 + $0x34] sm:$0xf] }
 0x126   : > { %368 = vst [vmem:[#allocation3 + $0x10] sm:$0xff] %v366_v20  ;;  %v971_v51 = vor.u32 %v1023_v42, %v970_v41  ;;  %v975_v52 = vor.u32 %v1022_v48, %v972_v43  ;;  %v1019_v17 = vld [vmem:[#allocation3 + $0x14] sm:$0xf0]  ;;  %v956_v18 = vld [vmem:[#allocation3 + $0x18] sm:$0xf0] }
 0x129   : > { %v504_v22 = vpop.permute.xlu0 %503  ;;  %v298_v30 = vpop.permute.xlu1 %297 }
 0x12a   : > { %v507_v24 = vrot.slane %v504_v22, 4  ;;  %v300_v33 = vrot.slane %v298_v30, 4 }
 0x12c   : > { %v509_v25 = vsel %vm301_vm6, %v507_v24, %v508_v23 }
 0x12d   : > { %v511_v27 = vsel %vm283_vm4, %v504_v22, %v509_v25  ;;  %v954_v14 = vld [vmem:[#allocation3 + $0x10] sm:$0xf]  ;;  %v1018_v16 = vld [vmem:[#allocation3 + $0x14] sm:$0xf] }
 0x12e   : > { %v555_v38 = vunpack.c.l.b16 %v511_v27  ;;  %v556_v35 = vunpack.c.h.b16 %v511_v27  ;;  %v955_v19 = vor.u32 %v1019_v17, %v954_v14  ;;  %v959_v20 = vor.u32 %v1018_v16, %v956_v18 }
 0x130   : > { %v565_v36 = vpack.c.b16 %v555_v38, %v555_v38  ;;  %v566_v39 = vpack.c.b16 %v556_v35, %v556_v35  ;;  %v514_v38 = vld [vmem:[%s1375_s1] sm:$0xf]  ;;  %v743_v35 = vld [vmem:[#allocation2 + $0xc] sm:$0xf] }
 0x131   : > { %v296_v40 = vpop.permute.xlu0 %295  ;;  %748 = vrot.lane.b32.xlu1 %v743_v35, %s1095_s11 }
 0x132   : > { %v299_v44 = vrot.slane %v296_v40, 4  ;;  %v581_v31 = vsel %vm301_vm6, %v565_v36, 0  ;;  %v584_v45 = vsel %vm301_vm6, %v566_v39, 0 }
 0x133   : > { %589 = vmatpush.bf16.msra.mxu0 %v581_v31  ;;  %602 = vmatpush.bf16.msra.mxu1 %v584_v45 }
 0x134   : > { %v302_v49 = vsel %vm301_vm6, %v299_v44, %v300_v33 }
 0x135   : > { %v304_v50 = vsel %vm303_vm2, %v296_v40, %v302_v49 }
 0x136   : > { %306 = vst [vmem:[#allocation3] sm:$0xff] %v304_v50 }
 0x137   : > { %590 = vmatpush.bf16.msra.mxu0 %v971_v51  ;;  %603 = vmatpush.bf16.msra.mxu1 %v975_v52 }
 0x138   : > { %v528_v33 = vpop.permute.xlu1 %527 }
 0x139   : > { %v425_v55 = vpop.permute.xlu0 %424 }
 0x13a   : > { %v428_v34 = vrot.slane %v425_v55, 4 }
 0x13c   : > { %v430_v57 = vsel %vm301_vm6, %v428_v34, %v429_v56 }
 0x13d   : > { %v432_v58 = vsel %vm378_vm0, %v425_v55, %v430_v57  ;;  %v946_v22 = vld [vmem:[#allocation3] sm:$0xf]  ;;  %v1016_v24 = vld [vmem:[#allocation3 + $0x4] sm:$0xf] }
 0x13e   : > { %434 = vst [vmem:[#allocation3 + $0x28] sm:$0xff] %v432_v58 }
 0x141   : > { %v314_v62 = vpop.permute.xlu0 %313 }
 0x142   : > { %v316_v59 = vrot.slane %v314_v62, 4 }
 0x144   : > { %v317_v1 = vsel %vm301_vm6, %v315_v61, %v316_v59 }
 0x145   : > { %v319_v2 = vsel %vm318_vm8, %v312_v60, %v317_v1  ;;  %v1021_v7 = vld [vmem:[#allocation3 + $0x24] sm:$0xf0]  ;;  %v964_v9 = vld [vmem:[#allocation3 + $0x28] sm:$0xf0] }
 0x146   : > { %321 = vst [vmem:[#allocation3 + $0x8] sm:$0xff] %v319_v2  ;;  %v963_v10 = vor.u32 %v1021_v7, %v962_v63  ;;  %v967_v11 = vor.u32 %v1020_v0, %v964_v9 }
 0x148   : > { %591 = vmatpush.bf16.msra.mxu0 %v963_v10  ;;  %604 = vmatpush.bf16.msra.mxu1 %v967_v11 }
 0x14c   : > { %592 = vmatpush.bf16.msra.mxu0 %v955_v19  ;;  %605 = vmatpush.bf16.msra.mxu1 %v959_v20 }
 0x14d   : > { %v1017_v23 = vld [vmem:[#allocation3 + $0x4] sm:$0xf0]  ;;  %v948_v25 = vld [vmem:[#allocation3 + $0x8] sm:$0xf0] }
 0x14e   : > { %v947_v27 = vor.u32 %v1017_v23, %v946_v22  ;;  %v951_v30 = vor.u32 %v1016_v24, %v948_v25 }
 0x150   : > { %593 = vmatpush.bf16.msra.mxu0 %v947_v27  ;;  %606 = vmatpush.bf16.msra.mxu1 %v951_v30 }
 0x153   : > { %976 = vmatmul.msk.bf16.vlgmr.msra.gmra.mxu0 %vm575_vm9, %v514_v38  ;;  %977 = vmatmul.msk.bf16.vlgmr.msra.gmra.mxu1 %vm575_vm9, %v514_v38 }
 0x1d0   : > { %v595_v36 = vpop.f32.mrf.mxu0  ;;  %v608_v39 = vpop.f32.mrf.mxu1 }
 0x1d1   : > { %v596_v40 = vadd.f32 %v595_v36, %v528_v33  ;;  %v609_v41 = vadd.f32 %v608_v39, %v528_v33 }
 0x1d3   : > { %v612_v42 = vmax.f32 %v596_v40, 0.0  ;;  %v613_v43 = vmax.f32 %v609_v41, 0.0  ;;  %v749_v40 = vpop.permute.xlu1 %748 }
 0x1d5   : > { %v614_v44 = vpack.c.bf16 %v613_v43, %v612_v42  ;;  %v751_v42 = vrot.slane %v749_v40, 4 }
 0x1d7   : > { %615 = vst [vmem:[#allocation2 + $0x4] sm:$0xff] %v614_v44  ;;  %746 = vrot.lane.b32.xlu0 %v614_v44, %s1095_s11  ;;  %v758_v31 = vunpack.c.l.bf16 %v614_v44  ;;  %v759_v45 = vunpack.c.h.bf16 %v614_v44 }
 0x1d8   : > { %v597_v48 = vpop.f32.mrf.mxu0  ;;  %v610_v46 = vpop.f32.mrf.mxu1  ;;  %697 = vst [vmem:[#allocation3 + $0x20] sm:$0xff] %v614_v44 }
 0x1d9   : > { %v761_v49 = vmul.f32 %v1223_v3, %v758_v31  ;;  %v762_v50 = vmul.f32 %v759_v45, %v1232_v12  ;;  %v725_v51 = vmul.f32 %v1200_v47, %v758_v31  ;;  %v726_v52 = vmul.f32 %v759_v45, %v1207_v53 }
 0x1da   : > { %v703_v57 = vmul.f32 %v1264_v26, %v758_v31  ;;  %v704_v58 = vmul.f32 %v759_v45, %v1269_v32 }
 0x1db   : > { %v764_v55 = vpack.c.bf16 %v762_v50, %v761_v49  ;;  %v728_v56 = vpack.c.bf16 %v726_v52, %v725_v51 }
 0x1dc   : > { %v706_v0 = vpack.c.bf16 %v704_v58, %v703_v57  ;;  %v788_v58 = vld [vmem:[%s1378_s4] sm:$0xff] }
 0x1dd   : > { %768 = vrot.lane.b32.xlu2 %v764_v55, %s1090_s30  ;;  %732 = vrot.lane.b32.xlu1 %v728_v56, %s1094_s10 }
 0x1de   : > { %v674_v34 = vld [vmem:[#allocation2] sm:$0xff]  ;;  %v617_v3 = vld [vmem:[#allocation2 + $0x8] sm:$0xf] }
 0x1df   : > { %v676_v60 = vunpack.c.l.bf16 %v674_v34  ;;  %v677_v61 = vunpack.c.h.bf16 %v674_v34  ;;  %v653_v62 = vld [vmem:[#allocation2 + $0x8] sm:$0xf]  ;;  %v620_v7 = vunpack.c.l.bf16 %v617_v3 }
 0x1e0   : > { %v675_v63 = vld [vmem:[#allocation2 + $0x8] sm:$0xf]  ;;  %v656_v26 = vunpack.c.l.bf16 %v653_v62 }
 0x1e1   : > { %v679_v12 = vmul.f32 %v1173_v29, %v676_v60  ;;  %v680_v47 = vmul.f32 %v677_v61, %v1190_v37  ;;  %v657_v53 = vmul.f32 %v1225_v4, %v676_v60  ;;  %v658_v59 = vmul.f32 %v677_v61, %v1237_v13 }
 0x1e2   : > { %v678_v9 = vunpack.c.l.bf16 %v675_v63  ;;  %v623_v29 = vmul.f32 %v1227_v8, %v620_v7  ;;  %v659_v37 = vmul.f32 %v1209_v54, %v656_v26  ;;  %v621_v11 = vmul.f32 %v1243_v15, %v676_v60  ;;  %v639_v54 = vld [vmem:[#allocation2 + $0x8] sm:$0xf]  ;;  %v771_v8 = vpop.permute.xlu0 %770  ;;  %v1028_v7 = vld [vmem:[#allocation3 + $0x24] sm:$0xf] }
 0x1e3   : > { %v682_v1 = vpack.c.bf16 %v680_v47, %v679_v12  ;;  %v660_v2 = vpack.c.bf16 %v658_v59, %v657_v53  ;;  %v622_v14 = vmul.f32 %v677_v61, %v1254_v21  ;;  %v773_v18 = vrot.slane %v771_v8, 4 }
 0x1e4   : > { %v681_v4 = vmul.f32 %v1171_v28, %v678_v9  ;;  %v625_v13 = vpack.c.bf16 %v623_v29, %v623_v29  ;;  %v661_v32 = vpack.c.bf16 %v659_v37, %v659_v37  ;;  %v735_v28 = vpop.permute.xlu2 %734 }
 0x1e5   : > { %686 = vrot.lane.b32.xlu0 %v682_v1, %s1092_s8  ;;  %710 = vrot.lane.b32.xlu2 %v706_v0, %s1089_s29  ;;  %v624_v16 = vpack.c.bf16 %v622_v14, %v621_v11  ;;  %v737_v48 = vrot.slane %v735_v28, 4 }
 0x1e6   : > { %664 = vrot.lane.b32.xlu1 %v660_v2, %s1093_s9  ;;  %v683_v10 = vpack.c.bf16 %v681_v4, %v681_v4  ;;  %v996_v2 = vld [vmem:[#allocation3 + $0x20] sm:$0xf] }
 0x1ea   : > { %v713_v21 = vpop.permute.xlu0 %712 }
 0x1eb   : > { %v715_v30 = vrot.slane %v713_v21, 4 }
 0x1ed   : > { %630 = vrot.lane.b32.xlu0 %v625_v13, %s1091_s7  ;;  %666 = vrot.lane.b32.xlu2 %v661_v32, %s1093_s9 }
 0x1ee   : > { %688 = vrot.lane.b32.xlu1 %v683_v10, %s1092_s8 }
 0x1f5   : > { %628 = vrot.lane.b32.xlu2 %v624_v16, %s1091_s7  ;;  %791 = vperm.xlu0 %1080, %v788_v58  }
 0x1f6   : > { %642 = vrot.lane.b32.xlu1 %v674_v34, %s1097_s12 }
 0x1fd   : > { %644 = vrot.lane.b32.xlu2 %v639_v54, %s1097_s12 }
 0x237   : > { %v769_v17 = vpop.permute.xlu2 %768 }
 0x238   : > { %v772_v19 = vrot.slane %v769_v17, 4 }
 0x23a   : > { %v774_v20 = vsel %vm301_vm6, %v772_v19, %v773_v18 }
 0x23b   : > { %v775_v22 = vsel %vm283_vm4, %v769_v17, %v774_v20 }
 0x23c   : > { %v819_v15 = vunpack.c.l.b16 %v775_v22  ;;  %v820_v23 = vunpack.c.h.b16 %v775_v22 }
 0x23e   : > { %v829_v24 = vpack.c.b16 %v819_v15, %v819_v15  ;;  %v830_v25 = vpack.c.b16 %v820_v23, %v820_v23 }
 0x23f   : > { %v711_v27 = vpop.permute.xlu2 %710 }
 0x240   : > { %v714_v38 = vrot.slane %v711_v27, 4  ;;  %v843_v35 = vsel %vm301_vm6, %v829_v24, 0  ;;  %v846_v33 = vsel %vm301_vm6, %v830_v25, 0 }
 0x241   : > { %851 = vmatpush.bf16.msra.mxu2 %v843_v35  ;;  %864 = vmatpush.bf16.msra.mxu3 %v846_v33 }
 0x242   : > { %v716_v36 = vsel %vm301_vm6, %v714_v38, %v715_v30 }
 0x243   : > { %v717_v39 = vsel %vm378_vm0, %v711_v27, %v716_v36  ;;  %v778_v36 = vld [vmem:[%s1377_s3] sm:$0xf] }
 0x244   : > { %719 = vst [vmem:[#allocation3 + $0x28] sm:$0xff] %v717_v39 }
 0x247   : > { %v667_v49 = vpop.permute.xlu2 %666 }
 0x248   : > { %v669_v56 = vrot.slane %v667_v49, 4 }
 0x249   : > { %v747_v41 = vpop.permute.xlu0 %746 }
 0x24a   : > { %v750_v43 = vrot.slane %v747_v41, 4 }
 0x24b   : > { %v1029_v63 = vld [vmem:[#allocation3 + $0x24] sm:$0xf0]  ;;  %v998_v0 = vld [vmem:[#allocation3 + $0x28] sm:$0xf0] }
 0x24c   : > { %v752_v44 = vsel %vm301_vm6, %v750_v43, %v751_v42  ;;  %v997_v37 = vor.u32 %v1029_v63, %v996_v2  ;;  %v1001_v4 = vor.u32 %v1028_v7, %v998_v0 }
 0x24d   : > { %v753_v31 = vsel %vm478_vm7, %v747_v41, %v752_v44 }
 0x24e   : > { %755 = vst [vmem:[#allocation3 + $0x38] sm:$0xff] %v753_v31 }
 0x24f   : > { %v733_v45 = vpop.permute.xlu1 %732  ;;  %v629_v12 = vpop.permute.xlu2 %628 }
 0x250   : > { %v736_v46 = vrot.slane %v733_v45, 4  ;;  %v632_v26 = vrot.slane %v629_v12, 4 }
 0x252   : > { %v738_v50 = vsel %vm301_vm6, %v736_v46, %v737_v48 }
 0x253   : > { %v739_v51 = vsel %vm346_vm3, %v733_v45, %v738_v50 }
 0x254   : > { %741 = vst [vmem:[#allocation3 + $0x30] sm:$0xff] %v739_v51 }
 0x255   : > { %v1031_v57 = vld [vmem:[#allocation3 + $0x34] sm:$0xf0]  ;;  %v1006_v62 = vld [vmem:[#allocation3 + $0x38] sm:$0xf0] }
 0x257   : > { %v687_v52 = vpop.permute.xlu0 %686  ;;  %v645_v54 = vpop.permute.xlu2 %644 }
 0x258   : > { %v665_v55 = vpop.permute.xlu1 %664  ;;  %v690_v13 = vrot.slane %v687_v52, 4  ;;  %v647_v8 = vrot.slane %v645_v54, 4 }
 0x259   : > { %v668_v34 = vrot.slane %v665_v55, 4 }
 0x25b   : > { %v670_v60 = vsel %vm301_vm6, %v668_v34, %v669_v56  ;;  %v1004_v61 = vld [vmem:[#allocation3 + $0x30] sm:$0xf]  ;;  %v1030_v3 = vld [vmem:[#allocation3 + $0x34] sm:$0xf] }
 0x25c   : > { %v671_v47 = vsel %vm365_vm1, %v665_v55, %v670_v60  ;;  %v1005_v53 = vor.u32 %v1031_v57, %v1004_v61  ;;  %v1009_v59 = vor.u32 %v1030_v3, %v1006_v62 }
 0x25d   : > { %673 = vst [vmem:[#allocation3 + $0x10] sm:$0xff] %v671_v47 }
 0x25e   : > { %852 = vmatpush.bf16.msra.mxu2 %v1005_v53  ;;  %865 = vmatpush.bf16.msra.mxu3 %v1009_v59 }
 0x25f   : > { %v631_v1 = vpop.permute.xlu0 %630 }
 0x260   : > { %v633_v9 = vrot.slane %v631_v1, 4  ;;  %v689_v29 = vpop.permute.xlu1 %688 }
 0x261   : > { %v691_v32 = vrot.slane %v689_v29, 4 }
 0x262   : > { %v634_v10 = vsel %vm301_vm6, %v632_v26, %v633_v9  ;;  %853 = vmatpush.bf16.msra.mxu2 %v997_v37  ;;  %866 = vmatpush.bf16.msra.mxu3 %v1001_v4 }
 0x263   : > { %v635_v11 = vsel %vm303_vm2, %v629_v12, %v634_v10  ;;  %v692_v14 = vsel %vm301_vm6, %v690_v13, %v691_v32 }
 0x264   : > { %637 = vst [vmem:[#allocation3] sm:$0xff] %v635_v11  ;;  %v693_v16 = vsel %vm397_vm5, %v687_v52, %v692_v14  ;;  %v988_v19 = vld [vmem:[#allocation3 + $0x10] sm:$0xf]  ;;  %v1026_v15 = vld [vmem:[#allocation3 + $0x14] sm:$0xf] }
 0x265   : > { %695 = vst [vmem:[#allocation3 + $0x18] sm:$0xff] %v693_v16 }
 0x267   : > { %v792_v39 = vpop.permute.xlu0 %791 }
 0x268   : > { %v643_v28 = vpop.permute.xlu1 %642 }
 0x269   : > { %v646_v17 = vrot.slane %v643_v28, 4 }
 0x26b   : > { %v648_v18 = vsel %vm301_vm6, %v646_v17, %v647_v8  ;;  %v980_v25 = vld [vmem:[#allocation3] sm:$0xf]  ;;  %v1024_v30 = vld [vmem:[#allocation3 + $0x4] sm:$0xf] }
 0x26c   : > { %v649_v20 = vsel %vm318_vm8, %v643_v28, %v648_v18  ;;  %v1027_v22 = vld [vmem:[#allocation3 + $0x14] sm:$0xf0]  ;;  %v990_v23 = vld [vmem:[#allocation3 + $0x18] sm:$0xf0] }
 0x26d   : > { %651 = vst [vmem:[#allocation3 + $0x8] sm:$0xff] %v649_v20  ;;  %v989_v21 = vor.u32 %v1027_v22, %v988_v19  ;;  %v993_v24 = vor.u32 %v1026_v15, %v990_v23 }
 0x26f   : > { %854 = vmatpush.bf16.msra.mxu2 %v989_v21  ;;  %867 = vmatpush.bf16.msra.mxu3 %v993_v24 }
 0x274   : > { %v1025_v27 = vld [vmem:[#allocation3 + $0x4] sm:$0xf0]  ;;  %v982_v38 = vld [vmem:[#allocation3 + $0x8] sm:$0xf0] }
 0x275   : > { %v981_v35 = vor.u32 %v1025_v27, %v980_v25  ;;  %v985_v33 = vor.u32 %v1024_v30, %v982_v38 }
 0x277   : > { %855 = vmatpush.bf16.msra.mxu2 %v981_v35  ;;  %868 = vmatpush.bf16.msra.mxu3 %v985_v33 }
 0x27a   : > { %1010 = vmatmul.msk.bf16.vlgmr.msra.gmra.mxu2 %vm575_vm9, %v778_v36  ;;  %1011 = vmatmul.msk.bf16.vlgmr.msra.gmra.mxu3 %vm575_vm9, %v778_v36 }
 0x2fd   : > { %v857_v40 = vpop.f32.mrf.mxu2  ;;  %v870_v41 = vpop.f32.mrf.mxu3 }
 0x2fe   : > { %v858_v42 = vadd.f32 %v857_v40, %v792_v39  ;;  %v871_v43 = vadd.f32 %v870_v41, %v792_v39 }
 0x300   : > { %v876_v44 = vadd.f32 %v858_v42, %v1152_v5  ;;  %v877_v31 = vadd.f32 %v871_v43, %v1154_v6 }
 0x302   : > { %878 = vst [vmem:[%s251_s26] sm:$0xff] %v876_v44 }
 0x303   : > { %879 = vst [vmem:[%s251_s26 + $0x8] sm:$0xff] %v877_v31 }
 0x305   : > { %v859_v45 = vpop.f32.mrf.mxu2  ;;  %v872_v48 = vpop.f32.mrf.mxu3 }
 0x306 PF: > { %s16_s21 = sadd.s32 1, %s1087_s21  }
 0x307   : > { %p13_p4 = scmp.ge.s32.totalorder %s16_s21, 4  }
 0x309   :  { %15 = sbr.rel (!%p13_p4) target bundleno = 1 (0x1), region = 74 }

</bundles_post_ra>
